<compile_context>
chip_gen: v7x
topology: tpu7x:2x2x1
jax: 0.10.0
libtpu: 0.0.40
codegen_flags: <defaults>
</compile_context>

<pallas_src>
import functools

import jax
import jax.numpy as jnp
from jax.experimental import pallas as pl
from jax.experimental.pallas import tpu as pltpu

IN_F, HID_F, OUT_F = 20, 16, 4
LANE = 128


def _reduce_rows(op, a):
    """Reduce an (R, N) tile over the (tiny) sublane axis with unrolled
    element-wise ops -- stays on the VPU, no cross-sublane XLU reduce."""
    out = a[0:1, :]
    for i in range(1, a.shape[0]):
        out = op(out, a[i:i + 1, :])
    return out


def _ga_mlp_kernel(x_ref, w1_ref, b1_ref, w2_ref, b2_ref, o_ref, *,
                   approx_reciprocal: bool):
    # x_ref:  (IN_F, TB)    feature-major batch tile (batch on the lane axis)
    # w1_ref: (HID_F, IN_F) resident      b1_ref: (HID_F, 1) f32
    # w2_ref: (OUT_F, HID_F) resident     b2_ref: (OUT_F, 1) f32
    # o_ref:  (OUT_F, TB)   lane-dense output tile
    x_t = x_ref[...]

    # h^T = W1^T @ x^T : (HID_F, TB) -- MXU with f32 accumulation.
    h = jnp.dot(w1_ref[...], x_t, preferred_element_type=jnp.float32)
    h = jnp.maximum(h + b1_ref[...], 0.0)              # bias (lane-bcast) + ReLU

    # logits^T = W2^T @ h^T : (OUT_F, TB)
    h = h.astype(w2_ref.dtype)
    logits = jnp.dot(w2_ref[...], h, preferred_element_type=jnp.float32)
    logits = logits + b2_ref[...]

    # Numerically stable softmax over the class axis (4 sublanes), lane-dense.
    m = _reduce_rows(jnp.maximum, logits)              # (1, TB)
    e = jnp.exp(logits - m)                            # (OUT_F, TB)
    s = _reduce_rows(jnp.add, e)                       # (1, TB)
    if approx_reciprocal:
        probs = e * pl.reciprocal(s, approx=True)      # EUP slot, ~free (opt-in)
    else:
        probs = e / s                                  # exact normalisation (default)
    o_ref[...] = probs.astype(o_ref.dtype)


def _round_up(n, m):
    return ((n + m - 1) // m) * m


def _pick_tile(batch, block_batch):
    """Batch tile on the lane axis: multiple of 128; >=2 grid steps when the
    batch allows it (so both v7x TensorCores get work)."""
    b_lanes = _round_up(max(batch, 1), LANE)
    if b_lanes <= LANE:
        return LANE, LANE
    half = _round_up((b_lanes + 1) // 2, LANE)
    tb = min(_round_up(block_batch, LANE), half)
    bp = _round_up(b_lanes, tb)
    return tb, bp


def ga_model_forward(x, w1, b1, w2, b2, *, block_batch=16384,
                     compute_dtype=jnp.float32, out_dtype=jnp.float32,
                     approx_reciprocal=False, x_is_transposed=False):
    """x: (B, 20) [or (20, B) if x_is_transposed] -> (B, 4) softmax probs.

    Weights use the x @ W orientation: w1 (20,16), b1 (16,), w2 (16,4), b2 (4,).
    The kernel runs fully transposed (feature-major) so that the batch lives on
    the 128-lane axis; ideally the producer emits x feature-major already
    (x_is_transposed=True) to avoid the one extra transpose pass here.
    """
    if x_is_transposed:
        B = x.shape[1]
        x_t = x.astype(compute_dtype)                          # (IN_F, B)
    else:
        B = x.shape[0]
        x_t = jnp.transpose(x).astype(compute_dtype)           # (IN_F, B)

    TB, Bp = _pick_tile(B, block_batch)
    if Bp != B:
        x_t = jnp.pad(x_t, ((0, 0), (0, Bp - B)))              # zero cols, sliced off

    w1_t = jnp.transpose(jnp.asarray(w1)).astype(compute_dtype)   # (HID_F, IN_F)
    w2_t = jnp.transpose(jnp.asarray(w2)).astype(compute_dtype)   # (OUT_F, HID_F)
    b1c = jnp.asarray(b1, jnp.float32).reshape(HID_F, 1)
    b2c = jnp.asarray(b2, jnp.float32).reshape(OUT_F, 1)

    in_itemsize = jnp.dtype(compute_dtype).itemsize
    out_itemsize = jnp.dtype(out_dtype).itemsize
    cost = pl.CostEstimate(
        flops=2 * Bp * (IN_F * HID_F + HID_F * OUT_F),
        transcendentals=Bp * OUT_F,
        bytes_accessed=Bp * IN_F * in_itemsize + Bp * OUT_F * out_itemsize,
    )

    kernel = functools.partial(_ga_mlp_kernel,
                               approx_reciprocal=approx_reciprocal)

    out_t = pl.pallas_call(
        kernel,
        out_shape=jax.ShapeDtypeStruct((OUT_F, Bp), out_dtype),
        grid_spec=pltpu.PrefetchScalarGridSpec(
            num_scalar_prefetch=0,
            grid=(Bp // TB,),
            in_specs=[
                pl.BlockSpec((IN_F, TB), lambda i: (0, i)),       # x streams by lane tile
                pl.BlockSpec((HID_F, IN_F), lambda i: (0, 0)),    # w1^T resident
                pl.BlockSpec((HID_F, 1), lambda i: (0, 0)),       # b1 resident
                pl.BlockSpec((OUT_F, HID_F), lambda i: (0, 0)),   # w2^T resident
                pl.BlockSpec((OUT_F, 1), lambda i: (0, 0)),       # b2 resident
            ],
            out_specs=pl.BlockSpec((OUT_F, TB), lambda i: (0, i)),  # lane-dense store
        ),
        compiler_params=pltpu.CompilerParams(
            dimension_semantics=("parallel",),                    # megacore on v7x
        ),
        cost_estimate=cost,
    )(x_t, w1_t, b1c, w2_t, b2c)

    return jnp.transpose(out_t[:, :B])                            # (B, OUT_F)


def init_params(key):
    """Deterministic init mirroring nn.Linear's default (Kaiming-uniform-ish)."""
    k1, k2, k3, k4 = jax.random.split(key, 4)
    lim1 = 1.0 / jnp.sqrt(float(IN_F))
    lim2 = 1.0 / jnp.sqrt(float(HID_F))
    w1 = jax.random.uniform(k1, (IN_F, HID_F), jnp.float32, -lim1, lim1)
    b1 = jax.random.uniform(k2, (HID_F,), jnp.float32, -lim1, lim1)
    w2 = jax.random.uniform(k3, (HID_F, OUT_F), jnp.float32, -lim2, lim2)
    b2 = jax.random.uniform(k4, (OUT_F,), jnp.float32, -lim2, lim2)
    return w1, b1, w2, b2


def reference_forward(x, w1, b1, w2, b2):
    h = jnp.maximum(x @ w1 + b1, 0.0)
    logits = h @ w2 + b2
    return jax.nn.softmax(logits, axis=1)


if __name__ == "__main__":
    key = jax.random.PRNGKey(0)
    kx, kp = jax.random.split(key)
    w1, b1, w2, b2 = init_params(kp)

    # Small batch (single grid step), default exact f32 path.
    B = 64
    x = jax.random.normal(kx, (B, IN_F), jnp.float32)
    ref = reference_forward(x, w1, b1, w2, b2)
    out = jax.block_until_ready(ga_model_forward(x, w1, b1, w2, b2))
    assert out.shape == (B, OUT_F)
    assert jnp.allclose(out, ref, atol=1e-4), "f32 path mismatch"
    assert jnp.allclose(jnp.sum(out, axis=1), 1.0, atol=1e-5), "rows must sum to 1"

    # Ragged batch spanning two grid steps (exercises lane padding + megacore split).
    Br = 300
    xr = jax.random.normal(kx, (Br, IN_F), jnp.float32)
    out_r = jax.block_until_ready(ga_model_forward(xr, w1, b1, w2, b2))
    assert out_r.shape == (Br, OUT_F)
    assert jnp.allclose(out_r, reference_forward(xr, w1, b1, w2, b2),
                        atol=1e-4), "ragged path mismatch"

    # Opt-in bandwidth-optimal path: bf16 MXU feed + approx EUP reciprocal.
    out_bf = jax.block_until_ready(
        ga_model_forward(x, w1, b1, w2, b2,
                         compute_dtype=jnp.bfloat16, approx_reciprocal=True))
    assert jnp.allclose(out_bf, ref, atol=2e-2), "bf16 path mismatch"

    # Pre-transposed (feature-major) producer path: no extra transpose pass.
    out_t = jax.block_until_ready(
        ga_model_forward(jnp.transpose(x), w1, b1, w2, b2, x_is_transposed=True))
    assert jnp.allclose(out_t, ref, atol=1e-4), "transposed-input path mismatch"

    print("KERNEL_OK")
</pallas_src>

<mosaic_0001>
module attributes {stable_mosaic.version = 11 : i64} {
  func.func @_ga_mlp_kernel(%arg0: i32, %arg1: memref<20x128xf32, #tpu.memory_space<vmem>>, %arg2: memref<16x20xf32, #tpu.memory_space<vmem>>, %arg3: memref<16x1xf32, #tpu.memory_space<vmem>>, %arg4: memref<4x16xf32, #tpu.memory_space<vmem>>, %arg5: memref<4x1xf32, #tpu.memory_space<vmem>>, %arg6: memref<4x128xf32, #tpu.memory_space<vmem>>) attributes {dimension_semantics = [#tpu.dimension_semantics<parallel>], iteration_bounds = array<i64: 1>, scalar_prefetch = 0 : i64, scratch_operands = 0 : i64, tpu.core_type = #tpu.core_type<tc>, window_params = [{transform_indices = @transform_0, window_bounds = array<i64: 20, 128>}, {pipeline_mode = #tpu.pipeline_mode<synchronous>, transform_indices = @transform_1, window_bounds = array<i64: 16, 20>}, {pipeline_mode = #tpu.pipeline_mode<synchronous>, transform_indices = @transform_2, window_bounds = array<i64: 16, 1>}, {pipeline_mode = #tpu.pipeline_mode<synchronous>, transform_indices = @transform_3, window_bounds = array<i64: 4, 16>}, {pipeline_mode = #tpu.pipeline_mode<synchronous>, transform_indices = @transform_4, window_bounds = array<i64: 4, 1>}, {transform_indices = @transform_5, window_bounds = array<i64: 4, 128>}]} {
    %c0 = arith.constant 0 : index
    %c0_0 = arith.constant 0 : index
    %0 = vector.load %arg1[%c0, %c0_0] : memref<20x128xf32, #tpu.memory_space<vmem>>, vector<20x128xf32>
    %c0_1 = arith.constant 0 : index
    %c0_2 = arith.constant 0 : index
    %1 = vector.load %arg2[%c0_1, %c0_2] : memref<16x20xf32, #tpu.memory_space<vmem>>, vector<16x20xf32>
    %cst = arith.constant dense<0.000000e+00> : vector<16x128xf32>
    %2 = tpu.matmul %1, %0, %cst {dimension_numbers = #tpu.dot_dimension_numbers<[1], [0], [0], [1], [0, 0, 1, 1], [], []>} : vector<16x20xf32>, vector<20x128xf32>, vector<16x128xf32> -> vector<16x128xf32>
    %c0_3 = arith.constant 0 : index
    %c0_4 = arith.constant 0 : index
    %3 = vector.load %arg3[%c0_3, %c0_4] : memref<16x1xf32, #tpu.memory_space<vmem>>, vector<16x1xf32>
    %4 = vector.broadcast %3 : vector<16x1xf32> to vector<16x128xf32>
    %5 = arith.addf %2, %4 : vector<16x128xf32>
    %cst_5 = arith.constant 0.000000e+00 : f32
    %6 = vector.broadcast %cst_5 : f32 to vector<16x128xf32>
    %7 = arith.maximumf %5, %6 : vector<16x128xf32>
    %c0_6 = arith.constant 0 : index
    %c0_7 = arith.constant 0 : index
    %8 = vector.load %arg4[%c0_6, %c0_7] : memref<4x16xf32, #tpu.memory_space<vmem>>, vector<4x16xf32>
    %cst_8 = arith.constant dense<0.000000e+00> : vector<4x128xf32>
    %9 = tpu.matmul %8, %7, %cst_8 {dimension_numbers = #tpu.dot_dimension_numbers<[1], [0], [0], [1], [0, 0, 1, 1], [], []>} : vector<4x16xf32>, vector<16x128xf32>, vector<4x128xf32> -> vector<4x128xf32>
    %c0_9 = arith.constant 0 : index
    %c0_10 = arith.constant 0 : index
    %10 = vector.load %arg5[%c0_9, %c0_10] : memref<4x1xf32, #tpu.memory_space<vmem>>, vector<4x1xf32>
    %11 = vector.broadcast %10 : vector<4x1xf32> to vector<4x128xf32>
    %12 = arith.addf %9, %11 : vector<4x128xf32>
    %13 = vector.extract_strided_slice %12 {offsets = [0, 0], sizes = [1, 128], strides = [1, 1]} : vector<4x128xf32> to vector<1x128xf32>
    %14 = vector.extract_strided_slice %12 {offsets = [1, 0], sizes = [1, 128], strides = [1, 1]} : vector<4x128xf32> to vector<1x128xf32>
    %15 = arith.maximumf %13, %14 : vector<1x128xf32>
    %16 = vector.extract_strided_slice %12 {offsets = [2, 0], sizes = [1, 128], strides = [1, 1]} : vector<4x128xf32> to vector<1x128xf32>
    %17 = arith.maximumf %15, %16 : vector<1x128xf32>
    %18 = vector.extract_strided_slice %12 {offsets = [3, 0], sizes = [1, 128], strides = [1, 1]} : vector<4x128xf32> to vector<1x128xf32>
    %19 = arith.maximumf %17, %18 : vector<1x128xf32>
    %20 = vector.broadcast %19 : vector<1x128xf32> to vector<4x128xf32>
    %21 = arith.subf %12, %20 : vector<4x128xf32>
    %22 = math.exp %21 : vector<4x128xf32>
    %23 = vector.extract_strided_slice %22 {offsets = [0, 0], sizes = [1, 128], strides = [1, 1]} : vector<4x128xf32> to vector<1x128xf32>
    %24 = vector.extract_strided_slice %22 {offsets = [1, 0], sizes = [1, 128], strides = [1, 1]} : vector<4x128xf32> to vector<1x128xf32>
    %25 = arith.addf %23, %24 : vector<1x128xf32>
    %26 = vector.extract_strided_slice %22 {offsets = [2, 0], sizes = [1, 128], strides = [1, 1]} : vector<4x128xf32> to vector<1x128xf32>
    %27 = arith.addf %25, %26 : vector<1x128xf32>
    %28 = vector.extract_strided_slice %22 {offsets = [3, 0], sizes = [1, 128], strides = [1, 1]} : vector<4x128xf32> to vector<1x128xf32>
    %29 = arith.addf %27, %28 : vector<1x128xf32>
    %30 = vector.broadcast %29 : vector<1x128xf32> to vector<4x128xf32>
    %31 = arith.divf %22, %30 : vector<4x128xf32>
    %c0_11 = arith.constant 0 : index
    %c0_12 = arith.constant 0 : index
    %32 = vector.load %arg6[%c0_11, %c0_12] : memref<4x128xf32, #tpu.memory_space<vmem>>, vector<4x128xf32>
    tpu.vector_store %arg6[%c0_11, %c0_12], %31 {strides = array<i32>} : memref<4x128xf32, #tpu.memory_space<vmem>>, vector<4x128xf32>,
    return
  }
  func.func @transform_0(%arg0: i32) -> (i32, i32) {
    %c0_i32 = arith.constant 0 : i32
    %c0_i32_0 = arith.constant 0 : i32
    return %c0_i32, %arg0 : i32, i32
  }
  func.func @transform_1(%arg0: i32) -> (i32, i32) {
    %c0_i32 = arith.constant 0 : i32
    %c0_i32_0 = arith.constant 0 : i32
    %c0_i32_1 = arith.constant 0 : i32
    return %c0_i32, %c0_i32_0 : i32, i32
  }
  func.func @transform_2(%arg0: i32) -> (i32, i32) {
    %c0_i32 = arith.constant 0 : i32
    %c0_i32_0 = arith.constant 0 : i32
    %c0_i32_1 = arith.constant 0 : i32
    return %c0_i32, %c0_i32_0 : i32, i32
  }
  func.func @transform_3(%arg0: i32) -> (i32, i32) {
    %c0_i32 = arith.constant 0 : i32
    %c0_i32_0 = arith.constant 0 : i32
    %c0_i32_1 = arith.constant 0 : i32
    return %c0_i32, %c0_i32_0 : i32, i32
  }
  func.func @transform_4(%arg0: i32) -> (i32, i32) {
    %c0_i32 = arith.constant 0 : i32
    %c0_i32_0 = arith.constant 0 : i32
    %c0_i32_1 = arith.constant 0 : i32
    return %c0_i32, %c0_i32_0 : i32, i32
  }
  func.func @transform_5(%arg0: i32) -> (i32, i32) {
    %c0_i32 = arith.constant 0 : i32
    %c0_i32_0 = arith.constant 0 : i32
    return %c0_i32, %arg0 : i32, i32
  }
}

</mosaic_0001>

<bundles_post_ra>
// kernel: tpu_custom_call.1
= control target key start
LH: loop header
LB: loop body
LE: loop exit
PB: predicated region body
PF: predicated region fallthrough
CT: control target
= control target key end

     0   :  { %10 = vsyncpa [#allocation3], 0  ;;  %s449_s0 = inlined_call_operand.hbm [shape: f32[20,128], index: 0, kind: input, shape index: {}]   ;;  %s450_s1 = inlined_call_operand.vmem [shape: f32[16,20], index: 1, kind: input, shape index: {}]   ;;  %s451_s2 = inlined_call_operand.vmem [shape: f32[16,1], index: 2, kind: input, shape index: {}]   ;;  %s452_s3 = inlined_call_operand.vmem [shape: f32[4,16], index: 3, kind: input, shape index: {}]   ;;  %s453_s4 = inlined_call_operand.vmem [shape: f32[4,1], index: 4, kind: input, shape index: {}]   ;;  %s454_s5 = inlined_call_operand.hbm [shape: f32[4,128], index: 5, kind: output, shape index: {}]  }
   0x1   :  { %11 = vsyncpa [#allocation4], 0  ;;  %s367_s18 = smov [#allocation2]   ;;  %s319_s22 = scalar_lea.hbm %s449_s0, 384 }
   0x2   :  { %s17_s19 = sshll.u32 %s367_s18, 4  ;;  %p320_p0 = scmp.ne.s32.totalorder %s449_s0, %s319_s22  ;;  %s18_s19 = int_to_ptr.vmem [resolvable:$true] %s17_s19 }
   0x3   :  { %p323_p1 = scmp.lt.u32.totalorder %s319_s22, %s449_s0 }
   0x5   :  { %p325_p2 = pnand %p323_p1, %p320_p0 }
   0x7   :  { %328 = shalt.err (!%p325_p2)
}
   0x8   :  { %s329_s27 = scalar_lea.vmem %s18_s19, 384  ;;  %p334_p4 = scmp.lt.s32.totalorder %s18_s19, %s18_s19 }
   0x9   :  { %p330_p3 = scmp.ne.s32.totalorder %s18_s19, %s329_s27  ;;  %p335_p5 = scmp.lt.s32.totalorder %s329_s27, %s329_s27 }
   0xb   :  { %p336_p6 = por %p335_p5, %p334_p4 }
   0xd   :  { %p337_p7 = pnand %p336_p6, %p330_p3 }
   0xf   :  { %340 = shalt.err (!%p337_p7)
}
  0x10   :  { %s368_s28 = smov 128   ;;  %s369_s29 = smov 8  }
  0x11   :  { %23 = dma.hbm_to_vmem [thread:$0]  %s449_s0, 384, %s18_s19, [#allocation3], %s368_s28, %s368_s28, %s369_s29  }
  0x12   :  { %363 = dma.done.wait [#allocation3], 384  }
  0x13   :  { %364 = vsyncadd [#allocation3], 4294966912  ;;  %v370_v0 = vmov 0   ;;  %vm52_vm0 = vcmask 162816   ;;  %v35_v1 = vld [vmem:[#allocation2] sm:$0xff]  ;;  %v36_v2 = vld [vmem:[#allocation2 + $0x8] sm:$0xff]  ;;  %v231_v23 = vlaneseq }
  0x14   :  { %313 = vset.pattern.permute.xlu0 %v370_v0  ;;  %314 = vset.pattern.permute.xlu1 %v370_v0  ;;  %v298_v3 = vpack.c.bf16 %v36_v2, %v35_v1  ;;  %v38_v4 = vld [vmem:[%s450_s1] sm:$0xff]  ;;  %v37_v6 = vld [vmem:[#allocation2 + $0x10] sm:$0xf]  ;;  %vm59_vm1 = vcmask 1043456   ;;  %v41_v7 = vld [vmem:[%s451_s2 + $0x8] sm:$0xff]  ;;  %v371_v9 = vmov 0.0|0.0  }
  0x15   :  { %v40_v5 = vld [vmem:[%s451_s2] sm:$0xff]  ;;  %288 = vmatprep.mubr.msk.f32.mxu0 %vm52_vm0, %v38_v4  ;;  %v39_v8 = vld [vmem:[%s450_s1 + $0x8] sm:$0xff]  ;;  %302 = vmatprep.subr.bf16.mxu1 %v371_v9  ;;  %vm372_vm2 = vmmov 0   ;;  %v373_v10 = vmov 0.0   ;;  %vm147_vm3 = vcmask 130048   ;;  %v232_v28 = vshrl.u32 %v231_v23, 7 }
  0x16   :  { %44 = vperm.xlu0 %313, %v40_v5   ;;  %299 = vmatprep.subr.bf16.mxu0 %v298_v3  ;;  %v141_v11 = vld [vmem:[%s453_s4] sm:$0xf] }
  0x17   :  { %301 = vmatpush3.bf16.msra.mxu0 %v298_v3  ;;  %295 = vmatprep.mubr.msk.f32.mxu1 %vm372_vm2, %v373_v10  ;;  %v140_v21 = vld [vmem:[%s452_s3] sm:$0xf]  ;;  %v233_v33 = vsub.s32 0, %v232_v28  ;;  %s374_s3 = smov [#allocation5]  }
  0x18   :  { %286 = vmatprep.subr.msk.mxu0 %vm59_vm1, %v37_v6  ;;  %144 = vperm.xlu1 %314, %v141_v11   ;;  %s261_s4 = sshll.u32 %s374_s3, 4  ;;  %s262_s4 = int_to_ptr.vmem [resolvable:$true] %s261_s4 }
  0x19   :  { %s341_s16 = scalar_lea.vmem %s262_s4, 64  ;;  %p346_p9 = scmp.lt.s32.totalorder %s262_s4, %s262_s4 }
  0x1a   :  { %49 = vperm.xlu0 %313, %v41_v7   ;;  %p342_p8 = scmp.ne.s32.totalorder %s262_s4, %s341_s16  ;;  %p347_p10 = scmp.lt.s32.totalorder %s341_s16, %s341_s16 }
  0x1b   :  { %287 = vmatpush3.msk.msra.mxu0 %vm59_vm1, %v37_v6 }
  0x1c   :  { %289 = vmatmul.mubr.msk.f32.vlgmr.msra.gmra.mrb[0].mxu0 %vm52_vm0, %v39_v8  ;;  %p348_p11 = por %p347_p10, %p346_p9 }
  0x1e   :  { %p349_p12 = pnand %p348_p11, %p342_p8 }
  0x95   :  { %v45_v12 = vpop.permute.xlu0 %44 }
  0x97   :  { %v145_v22 = vpop.permute.xlu1 %144 }
  0x99   :  { %v50_v13 = vpop.permute.xlu0 %49 }
  0xef   :  { %v290_v14 = vpop.f32.mrb[0].mxu0 }
  0xf0   :  { %v135_v15 = vadd.f32 %v290_v14, %v50_v13  ;;  %v129_v16 = vpop.f32.mrb[1].mxu0 }
  0xf1   :  { %v130_v17 = vadd.f32 %v129_v16, %v45_v12 }
  0xf2   :  { %v139_v18 = vmax.f32 %v135_v15, 0.0 }
  0xf3   :  { %v138_v19 = vmax.f32 %v130_v17, 0.0 }
  0xf5   :  { %v303_v20 = vpack.c.bf16 %v139_v18, %v138_v19 }
  0xf7   :  { %304 = vmatpush3.bf16.msra.mxu1 %v303_v20 }
  0xfa   :  { %296 = vmatmul.mubr.msk.f32.vlgmr.msra.gmra.mrb[0].mxu1 %vm147_vm3, %v140_v21 }
 0x1cd   :  { %v217_v24 = vpop.f32.mrb[0].mxu1 }
 0x1ce   :  { %v218_v25 = vadd.f32 %v217_v24, %v145_v22  ;;  %v297_v26 = vpop.f32.mrb[1].mxu1 }
 0x1d0   :  { %v222_v27 = vrot.slane %v218_v25, 1  ;;  %v225_v30 = vrot.slane %v218_v25, 2  ;;  %v228_v32 = vrot.slane %v218_v25, 3 }
 0x1d2   :  { %v224_v29 = vmax.f32 %v218_v25, %v222_v27 }
 0x1d4   :  { %v227_v31 = vmax.f32 %v224_v29, %v225_v30 }
 0x1d6   :  { %v230_v34 = vmax.f32 %v227_v31, %v228_v32 }
 0x1d8   :  { %v234_v35 = vrot.slane %v230_v34, %v233_v33 }
 0x1da   :  { %v235_v36 = vsub.f32 %v218_v25, %v234_v35 }
 0x1dc   :  { %v236_v37 = vmul.f32 1.442695, %v235_v36 }
 0x1de   :  { %315 = vpow2.f32 %v236_v37 }
 0x1e8   :  { %v316_v38 = vpop.eup %315 }
 0x1e9   :  { %v239_v39 = vrot.slane %v316_v38, 1  ;;  %v242_v41 = vrot.slane %v316_v38, 2  ;;  %v245_v43 = vrot.slane %v316_v38, 3 }
 0x1eb   :  { %v241_v40 = vadd.f32 %v316_v38, %v239_v39 }
 0x1ed   :  { %v244_v42 = vadd.f32 %v242_v41, %v241_v40 }
 0x1ef   :  { %v247_v44 = vadd.f32 %v245_v43, %v244_v42 }
 0x1f1   :  { %v251_v45 = vrot.slane %v247_v44, %v233_v33 }
 0x1f3   :  { %317 = vrcp.f32 %v251_v45 }
 0x1fd   :  { %v318_v46 = vpop.eup %317 }
 0x1fe   :  { %v253_v47 = vmul.f32 %v318_v46, %v316_v38 }
 0x200   :  { %254 = vst [vmem:[#allocation5] sm:$0xf] %v253_v47 }
 0x201   :  { %352 = shalt.err (!%p349_p12)
}
 0x202   :  { %s353_s19 = scalar_lea.hbm %s454_s5, 64 }
 0x203   :  { %p354_p13 = scmp.ne.s32.totalorder %s454_s5, %s353_s19  ;;  %p357_p0 = scmp.lt.u32.totalorder %s353_s19, %s454_s5 }
 0x205   :  { %p359_p1 = pnand %p357_p0, %p354_p13 }
 0x207   :  { %362 = shalt.err (!%p359_p1)
}
 0x208   :  { %264 = dma.vmem_to_hbm [thread:$0]  %s262_s4, 64, %s454_s5, [#allocation4]  }
 0x209   :  { %365 = dma.done.wait [#allocation4], 64  }
 0x20a   :  { %366 = vsyncadd [#allocation4], 4294967232 }
 0x20b   :  { %268 = vsyncpa [#allocation3], 1 }
 0x20c   :  { %269 = vsyncpa [#allocation4], 1 }

</bundles_post_ra>
